<compile_context>
chip_gen: v5e
topology: v5e:2x2
jax: 0.10.0
libtpu: 0.0.40
codegen_flags: <defaults>
</compile_context>

<pallas_src>
import jax
import jax.numpy as jnp
from jax import lax
from jax.experimental import pallas as pl
from jax.experimental.pallas import tpu as pltpu

DIN = 40    # in_features  (nn.Linear(40, 30))
DOUT = 30   # out_features


def nest_mlp_kernel(x_ref, w_ref, b_ref, o_ref):
    # MXU matmul in f32 (HIGHEST precision: matches f32 PyTorch semantics;
    # compute is free filler — this kernel is HBM-DMA bound).
    y = jnp.dot(
        x_ref[...],
        w_ref[...],
        preferred_element_type=jnp.float32,
        precision=lax.Precision.HIGHEST,
    )
    # Bias add + ReLU on the VPU; direct (tb, 30) store (masked vst is fine).
    o_ref[...] = jnp.maximum(y + b_ref[...], 0.0).astype(o_ref.dtype)


def nest_mlp(x, w, b, *, tb=1024):
    """y = relu(x @ w + b); x: (B, 40) f32, w: (40, 30), b: (1, 30) -> (B, 30)."""
    B, din = x.shape
    assert din == DIN and w.shape == (DIN, DOUT) and b.shape == (1, DOUT)

    w = w.astype(jnp.float32)
    b = b.astype(jnp.float32)

    # Batch-tile selection.  Block's 2nd-to-last dim must be a multiple of 8
    # or equal the full array dim, so either take the whole batch as one block
    # (tiny B) or use a sublane-aligned tile; the ragged last block (when
    # B % tb != 0) is handled by Pallas — no zero-padding pass over x.
    if B <= 8:
        tb_eff = B                                   # single full-batch block
    else:
        tb_eff = max(8, (min(tb, B) // 8) * 8)       # sublane-aligned tile
        # v7x: keep >= 2 grid steps so the parallel axis spans both TCs.
        half = ((pl.cdiv(B, 2) + 7) // 8) * 8
        tb_eff = min(tb_eff, half)
    n_tiles = pl.cdiv(B, tb_eff)

    return pl.pallas_call(
        nest_mlp_kernel,
        out_shape=jax.ShapeDtypeStruct((B, DOUT), jnp.float32),
        grid=(n_tiles,),
        in_specs=[
            # batch-tiled activations (double-buffered DMA across tiles)
            pl.BlockSpec((tb_eff, DIN), lambda i: (i, 0)),
            # weight / bias: constant block index -> VMEM-resident, no re-DMA
            pl.BlockSpec((DIN, DOUT), lambda i: (0, 0)),
            pl.BlockSpec((1, DOUT), lambda i: (0, 0)),
        ],
        out_specs=pl.BlockSpec((tb_eff, DOUT), lambda i: (i, 0)),
        compiler_params=pltpu.CompilerParams(
            # batch tiles are independent -> shard across both TCs on v7x
            dimension_semantics=("parallel",),
            # per-block footprint is < 1 MiB even at tb=2048; ample headroom
            # on every generation (v5e default scoped VMEM is only 16 MiB)
            vmem_limit_bytes=32 * 1024 * 1024,
        ),
    )(x, w, b)


if __name__ == "__main__":
    key = jax.random.PRNGKey(0)
    k_x, k_w, k_b = jax.random.split(key, 3)

    # Small demo batch; feature dims are fixed by the module: nn.Linear(40, 30).
    # B=64 with the tb clamp exercises a 2-step batch grid.
    B = 64

    # torch.nn.Linear default init: U(-1/sqrt(fan_in), 1/sqrt(fan_in)).
    bound = 1.0 / (DIN ** 0.5)
    w = jax.random.uniform(k_w, (DIN, DOUT), jnp.float32, -bound, bound)
    b = jax.random.uniform(k_b, (1, DOUT), jnp.float32, -bound, bound)
    x = jax.random.normal(k_x, (B, DIN), jnp.float32)

    out = nest_mlp(x, w, b)
    out = jax.block_until_ready(out)

    # Reference in plain JAX at matching (f32, highest) precision.
    ref = jnp.maximum(
        jnp.dot(x, w, precision=lax.Precision.HIGHEST) + b, 0.0)

    assert out.shape == (B, DOUT)
    max_err = float(jnp.max(jnp.abs(out - ref)))
    assert jnp.allclose(out, ref, atol=1e-5, rtol=1e-5), max_err

    print("KERNEL_OK")
</pallas_src>

<mosaic_0001>
module attributes {stable_mosaic.version = 11 : i64} {
  func.func @nest_mlp_kernel(%arg0: i32, %arg1: memref<32x40xf32, #tpu.memory_space<vmem>>, %arg2: memref<40x30xf32, #tpu.memory_space<vmem>>, %arg3: memref<1x30xf32, #tpu.memory_space<vmem>>, %arg4: memref<32x30xf32, #tpu.memory_space<vmem>>) attributes {dimension_semantics = [#tpu.dimension_semantics<parallel>], iteration_bounds = array<i64: 2>, scalar_prefetch = 0 : i64, scratch_operands = 0 : i64, tpu.core_type = #tpu.core_type<tc>, window_params = [{transform_indices = @transform_0, window_bounds = array<i64: 32, 40>}, {pipeline_mode = #tpu.pipeline_mode<synchronous>, transform_indices = @transform_1, window_bounds = array<i64: 40, 30>}, {pipeline_mode = #tpu.pipeline_mode<synchronous>, transform_indices = @transform_2, window_bounds = array<i64: 1, 30>}, {transform_indices = @transform_3, window_bounds = array<i64: 32, 30>}]} {
    %c0 = arith.constant 0 : index
    %c0_0 = arith.constant 0 : index
    %0 = vector.load %arg1[%c0, %c0_0] : memref<32x40xf32, #tpu.memory_space<vmem>>, vector<32x40xf32>
    %c0_1 = arith.constant 0 : index
    %c0_2 = arith.constant 0 : index
    %1 = vector.load %arg2[%c0_1, %c0_2] : memref<40x30xf32, #tpu.memory_space<vmem>>, vector<40x30xf32>
    %cst = arith.constant dense<0.000000e+00> : vector<32x30xf32>
    %2 = tpu.matmul %0, %1, %cst {dimension_numbers = #tpu.dot_dimension_numbers<[1], [0], [0], [1], [0, 0, 1, 1], [], []>, precision = #tpu.contract_precision<fp32>} : vector<32x40xf32>, vector<40x30xf32>, vector<32x30xf32> -> vector<32x30xf32>
    %c0_3 = arith.constant 0 : index
    %c0_4 = arith.constant 0 : index
    %3 = vector.load %arg3[%c0_3, %c0_4] : memref<1x30xf32, #tpu.memory_space<vmem>>, vector<1x30xf32>
    %4 = vector.broadcast %3 : vector<1x30xf32> to vector<32x30xf32>
    %5 = arith.addf %2, %4 : vector<32x30xf32>
    %cst_5 = arith.constant 0.000000e+00 : f32
    %6 = vector.broadcast %cst_5 : f32 to vector<32x30xf32>
    %7 = arith.maximumf %5, %6 : vector<32x30xf32>
    %c0_6 = arith.constant 0 : index
    %c0_7 = arith.constant 0 : index
    %8 = vector.load %arg4[%c0_6, %c0_7] : memref<32x30xf32, #tpu.memory_space<vmem>>, vector<32x30xf32>
    tpu.vector_store %arg4[%c0_6, %c0_7], %7 {strides = array<i32>} : memref<32x30xf32, #tpu.memory_space<vmem>>, vector<32x30xf32>,
    return
  }
  func.func @transform_0(%arg0: i32) -> (i32, i32) {
    %c0_i32 = arith.constant 0 : i32
    %c0_i32_0 = arith.constant 0 : i32
    return %arg0, %c0_i32 : i32, i32
  }
  func.func @transform_1(%arg0: i32) -> (i32, i32) {
    %c0_i32 = arith.constant 0 : i32
    %c0_i32_0 = arith.constant 0 : i32
    %c0_i32_1 = arith.constant 0 : i32
    return %c0_i32, %c0_i32_0 : i32, i32
  }
  func.func @transform_2(%arg0: i32) -> (i32, i32) {
    %c0_i32 = arith.constant 0 : i32
    %c0_i32_0 = arith.constant 0 : i32
    %c0_i32_1 = arith.constant 0 : i32
    return %c0_i32, %c0_i32_0 : i32, i32
  }
  func.func @transform_3(%arg0: i32) -> (i32, i32) {
    %c0_i32 = arith.constant 0 : i32
    %c0_i32_0 = arith.constant 0 : i32
    return %arg0, %c0_i32 : i32, i32
  }
}

</mosaic_0001>

<bundles_post_ra>
// kernel: tpu_custom_call.1
= control target key start
LH: loop header
LB: loop body
LE: loop exit
PB: predicated region body
PF: predicated region fallthrough
CT: control target
= control target key end

     0   :  { %s614_s12 = smov 0   ;;  %s759_s0 = inlined_call_operand.vmem [shape: f32[64,40], index: 0, kind: input, shape index: {}]   ;;  %s760_s1 = inlined_call_operand.vmem [shape: f32[40,30], index: 1, kind: input, shape index: {}]   ;;  %s761_s2 = inlined_call_operand.vmem [shape: f32[1,30], index: 2, kind: input, shape index: {}]   ;;  %s762_s3 = inlined_call_operand.vmem [shape: f32[64,30], index: 3, kind: output, shape index: {}]  }
   0x1 LB: > { %s556_s13 = sadd.s32 4294967295, %s592_s12   ;;  %p560_p0 = scmp.ge.s32.totalorder %s592_s12, 1  ;;  %s592_s12 = sphi %s614_s12, %s13_s12  }
   0x2   : > { %p138_p1 = scmp.lt.s32.totalorder %s592_s12, 3 }
   0x4   : > { %p139_p2 = pnand %p560_p0, %p138_p1 }
   0x5   : > { %s561_s20 = sshll.u32 (!%p139_p2), %s556_s13, 2 }
   0x6   : > { %142 = sbr.rel (%p139_p2) target bundleno = 212 (0xd4), region = 32  ;;  %p163_p3 = scmp.lt.s32.totalorder (!%p139_p2), %s561_s20, 7 }
   0xb   : > { %v182_v0 = vld [vmem:[%s760_s1 + $0x20] sm:$0xff]  ;;  %v181_v1 = vld [vmem:[%s760_s1 + $0x18] sm:$0xff]  ;;  %v180_v2 = vld [vmem:[%s760_s1 + $0x10] sm:$0xff]  ;;  %s764_s20 = smov (!%p163_p3, %s561_s20), 7  ;;  %vm187_vm0 = vcmask 326656   ;;  %vm495_vm1 = vcmask 244736  }
   0xc   : > { %v631_v3 = vand.u32 4294901760, %v182_v0  ;;  %v633_v4 = vand.u32 4294901760, %v181_v1  ;;  %v635_v5 = vand.u32 4294901760, %v180_v2  ;;  %v179_v6 = vld [vmem:[%s760_s1 + $0x8] sm:$0xff]  ;;  %v178_v7 = vld [vmem:[%s760_s1] sm:$0xff]  ;;  %s562_s25 = sshll.u32 %s764_s20, 3 }
   0xd   : > { %v643_v8 = vand.u32 4294901760, %v179_v6  ;;  %v645_v9 = vand.u32 4294901760, %v178_v7  ;;  %s166_s28 = scalar_lea.vmem %s759_s0, %s562_s25  ;;  %s746_s6 = scalar_lea.vmem %s762_s3, %s562_s25 }
   0xe   : > { %567 = vmatpush.msra.mxu2 %v631_v3  ;;  %v266_v10 = vsub.f32 %v182_v0, %v631_v3  ;;  %v650_v11 = vsub.f32 %v181_v1, %v633_v4  ;;  %v653_v12 = vsub.f32 %v180_v2, %v635_v5  ;;  %212 = vmatpush.msra.mxu0 %v631_v3  ;;  %v176_v23 = vld [vmem:[%s166_s28 + $0x10] sm:$0xff]  ;;  %v177_v24 = vld [vmem:[%s166_s28 + $0x18] sm:$0xff]  ;;  %v174_v25 = vld [vmem:[%s166_s28] sm:$0xff] }
   0xf   : > { %v659_v13 = vsub.f32 %v179_v6, %v643_v8  ;;  %v662_v14 = vsub.f32 %v178_v7, %v645_v9  ;;  %v195_v26 = vsel %vm187_vm0, %v176_v23, 0  ;;  %v198_v27 = vsel %vm187_vm0, %v177_v24, 0  ;;  %v175_v28 = vld [vmem:[%s166_s28 + $0x8] sm:$0xff]  ;;  %v585_v1 = vld [vmem:[%s761_s2] ss:$0 sm:$0xff] }
  0x10   : > { %568 = vmatpush.msra.mxu2 %v633_v4  ;;  %v267_v15 = vand.u32 4294901760, %v266_v10  ;;  %v273_v16 = vand.u32 4294901760, %v650_v11  ;;  %v279_v17 = vand.u32 4294901760, %v653_v12  ;;  %214 = vmatpush.msra.mxu0 %v633_v4  ;;  %v688_v32 = vand.u32 4294901760, %v195_v26 }
  0x11   : > { %v285_v18 = vand.u32 4294901760, %v659_v13  ;;  %v291_v19 = vand.u32 4294901760, %v662_v14  ;;  %v694_v34 = vand.u32 4294901760, %v198_v27  ;;  %v189_v35 = vsel %vm187_vm0, %v174_v25, 0 }
  0x12   : > { %v268_v20 = vsub.f32 %v266_v10, %v267_v15  ;;  %569 = vmatpush.msra.mxu2 %v635_v5  ;;  %v274_v21 = vsub.f32 %v650_v11, %v273_v16  ;;  %v280_v22 = vsub.f32 %v653_v12, %v279_v17  ;;  %216 = vmatpush.msra.mxu0 %v635_v5  ;;  %v221_v38 = vand.u32 4294901760, %v189_v35 }
  0x13   : > { %v286_v31 = vsub.f32 %v659_v13, %v285_v18  ;;  %v292_v33 = vsub.f32 %v662_v14, %v291_v19  ;;  %v699_v37 = vsub.f32 %v195_v26, %v688_v32  ;;  %v192_v39 = vsel %vm187_vm0, %v175_v28, 0 }
  0x14   : > { %v269_v29 = vand.u32 4294901760, %v268_v20  ;;  %v275_v30 = vand.u32 4294901760, %v274_v21  ;;  %570 = vmatpush.msra.mxu2 %v643_v8  ;;  %218 = vmatpush.msra.mxu0 %v643_v8  ;;  %v281_v36 = vand.u32 4294901760, %v280_v22  ;;  %v703_v40 = vsub.f32 %v198_v27, %v694_v34 }
  0x15   : > { %v229_v41 = vand.u32 4294901760, %v192_v39  ;;  %v287_v42 = vand.u32 4294901760, %v286_v31  ;;  %v239_v43 = vand.u32 4294901760, %v699_v37  ;;  %v222_v44 = vsub.f32 %v189_v35, %v221_v38 }
  0x16   : > { %572 = vmatpush.msra.mxu3 %v269_v29  ;;  %571 = vmatpush.msra.mxu2 %v645_v9  ;;  %v293_v47 = vand.u32 4294901760, %v292_v33  ;;  %v247_v48 = vand.u32 4294901760, %v703_v40 }
  0x17   : > { %270 = vmatpush.msra.mxu1 %v269_v29  ;;  %220 = vmatpush.msra.mxu0 %v645_v9  ;;  %v230_v45 = vsub.f32 %v192_v39, %v229_v41  ;;  %v240_v46 = vsub.f32 %v699_v37, %v239_v43  ;;  %v223_v49 = vand.u32 4294901760, %v222_v44 }
  0x18   : > { %325 = vmatpush.msrb.mxu2 %v266_v10  ;;  %573 = vmatpush.msra.mxu3 %v275_v30  ;;  %v248_v53 = vsub.f32 %v703_v40, %v247_v48 }
  0x19   : > { %276 = vmatpush.msra.mxu1 %v275_v30  ;;  %419 = vmatpush.msrb.mxu0 %v267_v15  ;;  %v241_v50 = vand.u32 4294901760, %v240_v46  ;;  %v224_v51 = vsub.f32 %v222_v44, %v223_v49  ;;  %v231_v52 = vand.u32 4294901760, %v230_v45 }
  0x1a   : > { %328 = vmatpush.msrb.mxu2 %v650_v11  ;;  %574 = vmatpush.msra.mxu3 %v281_v36  ;;  %v249_v56 = vand.u32 4294901760, %v248_v53 }
  0x1b   : > { %282 = vmatpush.msra.mxu1 %v281_v36  ;;  %423 = vmatpush.msrb.mxu0 %v273_v16  ;;  %v225_v54 = vand.u32 4294901760, %v224_v51  ;;  %v232_v55 = vsub.f32 %v230_v45, %v231_v52 }
  0x1c   : > { %331 = vmatpush.msrb.mxu2 %v653_v12  ;;  %575 = vmatpush.msra.mxu3 %v287_v42 }
  0x1d   : > { %288 = vmatpush.msra.mxu1 %v287_v42  ;;  %242 = vmatmul.f32.vlgmr.msra.gmra.mxu2 %v241_v50  ;;  %v233_v57 = vand.u32 4294901760, %v232_v55 }
  0x1e   : > { %334 = vmatpush.msrb.mxu2 %v659_v13  ;;  %576 = vmatpush.msra.mxu3 %v293_v47 }
  0x1f   : > { %304 = vmatmul.f32.vlgmr.msra.gmra.mxu3 %v688_v32  ;;  %294 = vmatpush.msra.mxu1 %v293_v47 }
  0x20   : > { %371 = vmatpush.msrb.mxu3 %v631_v3  ;;  %226 = vmatmul.f32.vlgmr.msra.gmra.mxu0 %v225_v54 }
  0x21   : > { %296 = vmatmul.f32.vlgmr.msra.gmra.mxu1 %v221_v38  ;;  %337 = vmatpush.msrb.mxu2 %v662_v14 }
  0x22   : > { %373 = vmatpush.msrb.mxu3 %v633_v4  ;;  %465 = vmatpush.msrb.mxu1 %v631_v3 }
  0x23   : > { %427 = vmatpush.msrb.mxu0 %v279_v17 }
  0x24   : > { %375 = vmatpush.msrb.mxu3 %v635_v5  ;;  %467 = vmatpush.msrb.mxu1 %v633_v4 }
  0x25   : > { %431 = vmatpush.msrb.mxu0 %v285_v18  ;;  %250 = vmatmul.f32.gmra.mxu2 %v249_v56 }
  0x26   : > { %377 = vmatpush.msrb.mxu3 %v643_v8  ;;  %469 = vmatpush.msrb.mxu1 %v635_v5 }
  0x27   : > { %308 = vmatmul.f32.gmra.mxu3 %v694_v34  ;;  %435 = vmatpush.msrb.mxu0 %v291_v19 }
  0x28   : > { %379 = vmatpush.msrb.mxu3 %v645_v9  ;;  %234 = vmatmul.f32.gmra.mxu0 %v233_v57 }
  0x29   : > { %300 = vmatmul.f32.gmra.mxu1 %v229_v41 }
  0x2a   : > { %471 = vmatpush.msrb.mxu1 %v643_v8 }
  0x2c   : > { %473 = vmatpush.msrb.mxu1 %v645_v9 }
  0x2d   : > { %340 = vmatmul.f32.vlgmr.msrb.gmra.mxu2 %v222_v44 }
  0x2f   : > { %383 = vmatmul.f32.vlgmr.msrb.gmra.mxu3 %v223_v49 }
  0x30   : > { %437 = vmatmul.f32.vlgmr.msrb.gmra.mxu0 %v221_v38 }
  0x31   : > { %475 = vmatmul.f32.vlgmr.msrb.gmra.mxu1 %v221_v38 }
  0x35   : > { %345 = vmatmul.f32.gmra.mxu2 %v230_v45 }
  0x37   : > { %389 = vmatmul.f32.gmra.mxu3 %v231_v52 }
  0x38   : > { %441 = vmatmul.f32.gmra.mxu0 %v229_v41 }
  0x39   : > { %479 = vmatmul.f32.gmra.mxu1 %v229_v41 }
  0x3d   : > { %350 = vmatmul.f32.gmra.mxu2 %v699_v37 }
  0x3f   : > { %395 = vmatmul.f32.gmra.mxu3 %v239_v43 }
  0x40   : > { %445 = vmatmul.f32.gmra.mxu0 %v688_v32 }
  0x41   : > { %483 = vmatmul.f32.gmra.mxu1 %v688_v32 }
  0x45   : > { %355 = vmatmul.f32.gmra.mxu2 %v703_v40 }
  0x47   : > { %401 = vmatmul.f32.gmra.mxu3 %v247_v48 }
  0x48   : > { %449 = vmatmul.f32.gmra.mxu0 %v694_v34 }
  0x49   : > { %487 = vmatmul.f32.gmra.mxu1 %v694_v34 }
  0x9d   : > { %v227_v58 = vpop.f32.mrf.mxu0 }
  0x9e   : > { %v297_v59 = vpop.f32.mrf.mxu1  ;;  %v228_v3 = vadd.f32 %v585_v1, %v227_v58 }
  0xa0   : > { %v243_v60 = vpop.f32.mrf.mxu2  ;;  %v298_v6 = vadd.f32 %v297_v59, %v228_v3 }
  0xa1   : > { %v244_v21 = vadd.f32 %v585_v1, %v243_v60 }
  0xa2   : > { %v305_v61 = vpop.f32.mrf.mxu3 }
  0xa3   : > { %v306_v24 = vadd.f32 %v305_v61, %v244_v21 }
  0xa5   : > { %v235_v62 = vpop.f32.mrf.mxu0 }
  0xa6   : > { %v301_v63 = vpop.f32.mrf.mxu1  ;;  %v236_v10 = vadd.f32 %v585_v1, %v235_v62 }
  0xa8   : > { %v251_v0 = vpop.f32.mrf.mxu2  ;;  %v302_v14 = vadd.f32 %v301_v63, %v236_v10 }
  0xa9   : > { %v252_v32 = vadd.f32 %v585_v1, %v251_v0 }
  0xaa   : > { %v309_v2 = vpop.f32.mrf.mxu3 }
  0xab   : > { %v310_v35 = vadd.f32 %v309_v2, %v252_v32 }
  0xad   : > { %v438_v4 = vpop.f32.mrf.mxu0 }
  0xae   : > { %v476_v5 = vpop.f32.mrf.mxu1 }
  0xb0   : > { %v341_v7 = vpop.f32.mrf.mxu2 }
  0xb1   : > { %v342_v8 = vadd.f32 %v341_v7, %v298_v6 }
  0xb2   : > { %v384_v9 = vpop.f32.mrf.mxu3 }
  0xb3   : > { %v385_v11 = vadd.f32 %v384_v9, %v342_v8 }
  0xb5   : > { %v439_v12 = vadd.f32 %v438_v4, %v385_v11  ;;  %v442_v13 = vpop.f32.mrf.mxu0 }
  0xb6   : > { %v480_v17 = vpop.f32.mrf.mxu1 }
  0xb7   : > { %v477_v15 = vadd.f32 %v476_v5, %v439_v12 }
  0xb8   : > { %v346_v16 = vpop.f32.mrf.mxu2 }
  0xb9   : > { %v491_v18 = vmax.f32 %v477_v15, 0.0  ;;  %v347_v19 = vadd.f32 %v346_v16, %v302_v14 }
  0xba   : > { %v390_v20 = vpop.f32.mrf.mxu3 }
  0xbb   : > { %496 = vst.msk [vmem:[%s746_s6] sm:$0xff] %vm495_vm1, %v491_v18  ;;  %v391_v22 = vadd.f32 %v390_v20, %v347_v19 }
  0xbd   : > { %v443_v23 = vadd.f32 %v442_v13, %v391_v22  ;;  %v446_v27 = vpop.f32.mrf.mxu0 }
  0xbe   : > { %v484_v31 = vpop.f32.mrf.mxu1 }
  0xbf   : > { %v481_v25 = vadd.f32 %v480_v17, %v443_v23 }
  0xc0   : > { %v351_v26 = vpop.f32.mrf.mxu2 }
  0xc1   : > { %v492_v28 = vmax.f32 %v481_v25, 0.0  ;;  %v352_v29 = vadd.f32 %v351_v26, %v306_v24 }
  0xc2   : > { %v396_v30 = vpop.f32.mrf.mxu3 }
  0xc3   : > { %497 = vst.msk [vmem:[%s746_s6 + $0x8] sm:$0xff] %vm495_vm1, %v492_v28  ;;  %v397_v33 = vadd.f32 %v396_v30, %v352_v29 }
  0xc5   : > { %v447_v34 = vadd.f32 %v446_v27, %v397_v33  ;;  %v450_v41 = vpop.f32.mrf.mxu0 }
  0xc6   : > { %v488_v43 = vpop.f32.mrf.mxu1 }
  0xc7   : > { %v485_v36 = vadd.f32 %v484_v31, %v447_v34 }
  0xc8   : > { %v356_v37 = vpop.f32.mrf.mxu2 }
  0xc9   : > { %v493_v38 = vmax.f32 %v485_v36, 0.0  ;;  %v357_v39 = vadd.f32 %v356_v37, %v310_v35 }
  0xca   : > { %v402_v40 = vpop.f32.mrf.mxu3 }
  0xcb   : > { %498 = vst.msk [vmem:[%s746_s6 + $0x10] sm:$0xff] %vm495_vm1, %v493_v38  ;;  %v403_v42 = vadd.f32 %v402_v40, %v357_v39 }
  0xcd   : > { %v451_v44 = vadd.f32 %v450_v41, %v403_v42 }
  0xcf   : > { %v489_v45 = vadd.f32 %v488_v43, %v451_v44 }
  0xd1   : > { %v494_v46 = vmax.f32 %v489_v45, 0.0 }
  0xd3   : > { %499 = vst.msk [vmem:[%s746_s6 + $0x18] sm:$0xff] %vm495_vm1, %v494_v46 }
  0xd4 PF: > { %s13_s12 = sadd.s32 1, %s592_s12  }
  0xd5   : > { %p10_p4 = scmp.ge.s32.totalorder %s13_s12, 4  }
  0xd7   :  { %12 = sbr.rel (!%p10_p4) target bundleno = 1 (0x1), region = 62 }

</bundles_post_ra>
